<compile_context>
chip_gen: v5e
topology: v5e:2x2
jax: 0.10.0
libtpu: 0.0.40
codegen_flags: <defaults>
</compile_context>

<pallas_src>
import jax
import jax.numpy as jnp
from jax.experimental import pallas as pl
from jax.experimental.pallas import tpu as pltpu

EMBED_SIZE = 128   # E
NORM = 1.0         # max_norm of nn.Embedding


def gather_renorm_kernel(ids_ref, emb_hbm, e_out_ref, e_f32, sems):
    """Gather B_pad embedding rows and apply the max_norm (p=2) renorm.  Runs once.

    ids_ref   : (B_pad,) int32 in SMEM (scalar prefetch)
    emb_hbm   : (V, E) f32 embedding table, left in HBM (memory_space=pl.ANY)
    e_out_ref : (B_pad, E) activations (compute dtype, e.g. bf16)
    e_f32     : (B_pad, E) f32 VMEM scratch for the gathered rows
    sems      : (B_pad,) DMA semaphores
    """
    b_pad = e_f32.shape[0]

    # Issue all row DMAs first, then wait on all, so their latencies overlap.
    copies = []
    for i in range(b_pad):
        cp = pltpu.make_async_copy(
            emb_hbm.at[pl.ds(ids_ref[i], 1), :],   # (1, E) row selected by token id
            e_f32.at[pl.ds(i, 1), :],
            sems.at[i],
        )
        cp.start()
        copies.append(cp)
    for cp in copies:
        cp.wait()

    # nn.Embedding(max_norm=NORM) renorm:  if ||e|| > NORM: e *= NORM / (||e|| + 1e-7)
    e = e_f32[...]
    norm = jnp.sqrt(jnp.sum(e * e, axis=-1, keepdims=True))
    scale = jnp.where(norm > NORM, NORM / (norm + 1e-7), 1.0)
    e_out_ref[...] = (e * scale).astype(e_out_ref.dtype)


def projection_kernel(e_ref, w_ref, b_ref, out_ref):
    """Pure weight-streaming projection: (B_pad, E) @ (E, TV) + bias.

    e_ref   : (B_pad, E) activations, constant block (not re-DMAed across V tiles)
    w_ref   : (E, TV) weight tile (pre-transposed, compute dtype)
    b_ref   : (1, TV) f32 bias tile
    out_ref : (B_pad, TV) f32 output tile
    """
    acc = jnp.dot(e_ref[...], w_ref[...], preferred_element_type=jnp.float32)
    out_ref[...] = (acc + b_ref[...]).astype(out_ref.dtype)


def skipgram_forward(ids, emb_table, lin_w, lin_b, *, v_tile=2048,
                     compute_dtype=jnp.bfloat16):
    """ids: (B,) int; emb_table: (V, E) f32; lin_w: (V, E) (PyTorch layout); lin_b: (V,)."""
    B = ids.shape[0]
    V, E = emb_table.shape

    # Pad batch up to a multiple of 8 (f32 sublanes) so tiles are sublane-dense.
    B_pad = max(8, ((B + 7) // 8) * 8)
    ids_pad = ids.astype(jnp.int32)
    if B_pad != B:
        ids_pad = jnp.pad(ids_pad, (0, B_pad - B))             # pad with valid id 0

    # ---------------- Stage 1: gather + renorm (executed once). ----------------
    e = pl.pallas_call(
        gather_renorm_kernel,
        out_shape=jax.ShapeDtypeStruct((B_pad, E), compute_dtype),
        grid_spec=pltpu.PrefetchScalarGridSpec(
            num_scalar_prefetch=1,                              # ids -> SMEM
            grid=(1,),
            in_specs=[pl.BlockSpec(memory_space=pl.ANY)],       # table stays in HBM
            out_specs=pl.BlockSpec((B_pad, E), lambda i, ids_ref: (0, 0)),
            scratch_shapes=[
                pltpu.VMEM((B_pad, E), jnp.float32),
                pltpu.SemaphoreType.DMA((B_pad,)),
            ],
        ),
    )(ids_pad, emb_table)

    # ---------------- Stage 2: V-tiled weight-streaming projection. ----------------
    TV = max(128, (min(v_tile, V) // 128) * 128)                # lane-dense V tile
    V_pad = pl.cdiv(V, TV) * TV

    # Stream the weight in bf16 and pre-transpose to (E, V): K on sublanes, N on
    # lanes, so the in-kernel contraction needs no XLU transpose.
    # TODO(synk): in a real model, cast/transpose the weight once at load time
    # instead of per forward call.
    w = lin_w.astype(compute_dtype).T                           # (E, V)
    b = lin_b.astype(jnp.float32)
    if V_pad != V:
        w = jnp.pad(w, ((0, 0), (0, V_pad - V)))
        b = jnp.pad(b, (0, V_pad - V))
    b2 = b.reshape(1, V_pad)

    # Explicit VMEM cap derived from actual tile footprints (x2 headroom),
    # staying under v7x's 64 MiB physical VMEM.
    itemsize = jnp.dtype(compute_dtype).itemsize
    tile_bytes = (
        2 * (E * TV * itemsize)        # double-buffered weight tile
        + 2 * (TV * 4)                 # double-buffered bias tile
        + 2 * (B_pad * TV * 4)         # double-buffered output tile
        + B_pad * E * itemsize         # resident activation block
    )
    vmem_limit = int(min(64 * 1024 * 1024, max(8 * 1024 * 1024, 2 * tile_bytes)))

    out = pl.pallas_call(
        projection_kernel,
        out_shape=jax.ShapeDtypeStruct((B_pad, V_pad), jnp.float32),
        grid_spec=pltpu.PrefetchScalarGridSpec(
            num_scalar_prefetch=0,
            grid=(V_pad // TV,),
            in_specs=[
                pl.BlockSpec((B_pad, E), lambda j: (0, 0)),     # constant block: no re-DMA
                pl.BlockSpec((E, TV), lambda j: (0, j)),        # streamed weight V-tile
                pl.BlockSpec((1, TV), lambda j: (0, j)),        # bias tile
            ],
            out_specs=pl.BlockSpec((B_pad, TV), lambda j: (0, j)),
        ),
        compiler_params=pltpu.CompilerParams(
            dimension_semantics=("parallel",),                  # V tiles independent -> megacore
            vmem_limit_bytes=vmem_limit,
        ),
    )(e, w, b2)

    # Skip the slice entirely when shapes are already aligned (common real-vocab case).
    if B_pad != B or V_pad != V:
        out = out[:B, :V]
    return out


def skipgram_reference(ids, emb_table, lin_w, lin_b):
    e = emb_table[ids]                                          # (B, E)
    norm = jnp.sqrt(jnp.sum(e * e, axis=-1, keepdims=True))
    scale = jnp.where(norm > NORM, NORM / (norm + 1e-7), 1.0)
    e = e * scale
    return e @ lin_w.T + lin_b[None, :]


if __name__ == "__main__":
    key = jax.random.PRNGKey(0)
    k_emb, k_w, k_b, k_ids = jax.random.split(key, 4)

    VOCAB = 256   # V
    B = 8         # number of input token ids

    emb_table = jax.random.normal(k_emb, (VOCAB, EMBED_SIZE), dtype=jnp.float32)
    lin_w = jax.random.normal(k_w, (VOCAB, EMBED_SIZE), dtype=jnp.float32) * 0.05
    lin_b = jax.random.normal(k_b, (VOCAB,), dtype=jnp.float32) * 0.01

    ids = jax.random.randint(k_ids, (B,), 0, VOCAB, dtype=jnp.int32)

    # v_tile=128 -> grid=(2,) so the multi-V-tile path is exercised at this small vocab.
    out = skipgram_forward(ids, emb_table, lin_w, lin_b, v_tile=128)
    out = jax.block_until_ready(out)
    ref = skipgram_reference(ids, emb_table, lin_w, lin_b)
    assert out.shape == (B, VOCAB)
    assert jnp.allclose(out, ref, atol=1e-2, rtol=1e-2)   # bf16 weight stream, f32 accumulate

    # Unaligned case exercises the batch/vocab padding + epilogue slice path.
    ids2 = jax.random.randint(jax.random.PRNGKey(1), (5,), 0, 200, dtype=jnp.int32)
    out2 = skipgram_forward(ids2, emb_table[:200], lin_w[:200], lin_b[:200], v_tile=128)
    out2 = jax.block_until_ready(out2)
    ref2 = skipgram_reference(ids2, emb_table[:200], lin_w[:200], lin_b[:200])
    assert out2.shape == (5, 200)
    assert jnp.allclose(out2, ref2, atol=1e-2, rtol=1e-2)

    print("KERNEL_OK")
</pallas_src>

<mosaic_0001>
module attributes {stable_mosaic.version = 11 : i64} {
  func.func @gather_renorm_kernel(%arg0: i32, %arg1: memref<8xi32, #tpu.memory_space<smem>>, %arg2: memref<256x128xf32, #tpu.memory_space<any>>, %arg3: memref<8x128xbf16, #tpu.memory_space<vmem>>, %arg4: memref<8x128xf32, #tpu.memory_space<vmem>>, %arg5: memref<8x!tpu.dma_semaphore, #tpu.memory_space<semaphore_mem>>) attributes {dimension_semantics = [#tpu.dimension_semantics<arbitrary>], iteration_bounds = array<i64: 1>, scalar_prefetch = 1 : i64, scratch_operands = 2 : i64, tpu.core_type = #tpu.core_type<tc>, window_params = [{}, {pipeline_mode = #tpu.pipeline_mode<synchronous>, transform_indices = @transform_1, window_bounds = array<i64: 8, 128>}]} {
    %c0 = arith.constant 0 : index
    %0 = memref.load %arg1[%c0] : memref<8xi32, #tpu.memory_space<smem>>
    %c0_i32 = arith.constant 0 : i32
    %c0_i32_0 = arith.constant 0 : i32
    %1 = tpu.memref_slice %arg2[%0, %c0_i32_0] : memref<256x128xf32, #tpu.memory_space<any>> -> memref<1x128xf32, #tpu.memory_space<any>>
    %c0_i32_1 = arith.constant 0 : i32
    %c0_i32_2 = arith.constant 0 : i32
    %2 = tpu.memref_slice %arg4[%c0_i32_1, %c0_i32_2] : memref<8x128xf32, #tpu.memory_space<vmem>> -> memref<1x128xf32, #tpu.memory_space<vmem>>
    %3 = tpu.memref_slice %arg5[%c0_i32] : memref<8x!tpu.dma_semaphore, #tpu.memory_space<semaphore_mem>> -> memref<1x!tpu.dma_semaphore, #tpu.memory_space<semaphore_mem>>
    %4 = tpu.memref_squeeze %3 : memref<1x!tpu.dma_semaphore, #tpu.memory_space<semaphore_mem>> -> memref<!tpu.dma_semaphore, #tpu.memory_space<semaphore_mem>>
    tpu.enqueue_dma source(%1 : memref<1x128xf32, #tpu.memory_space<any>>) target(%2 : memref<1x128xf32, #tpu.memory_space<vmem>>) target_semaphore(%4 : memref<!tpu.dma_semaphore, #tpu.memory_space<semaphore_mem>>)
    %c1 = arith.constant 1 : index
    %5 = memref.load %arg1[%c1] : memref<8xi32, #tpu.memory_space<smem>>
    %c1_i32 = arith.constant 1 : i32
    %c0_i32_3 = arith.constant 0 : i32
    %6 = tpu.memref_slice %arg2[%5, %c0_i32_3] : memref<256x128xf32, #tpu.memory_space<any>> -> memref<1x128xf32, #tpu.memory_space<any>>
    %c1_i32_4 = arith.constant 1 : i32
    %c0_i32_5 = arith.constant 0 : i32
    %7 = tpu.memref_slice %arg4[%c1_i32_4, %c0_i32_5] : memref<8x128xf32, #tpu.memory_space<vmem>> -> memref<1x128xf32, #tpu.memory_space<vmem>>
    %8 = tpu.memref_slice %arg5[%c1_i32] : memref<8x!tpu.dma_semaphore, #tpu.memory_space<semaphore_mem>> -> memref<1x!tpu.dma_semaphore, #tpu.memory_space<semaphore_mem>>
    %9 = tpu.memref_squeeze %8 : memref<1x!tpu.dma_semaphore, #tpu.memory_space<semaphore_mem>> -> memref<!tpu.dma_semaphore, #tpu.memory_space<semaphore_mem>>
    tpu.enqueue_dma source(%6 : memref<1x128xf32, #tpu.memory_space<any>>) target(%7 : memref<1x128xf32, #tpu.memory_space<vmem>>) target_semaphore(%9 : memref<!tpu.dma_semaphore, #tpu.memory_space<semaphore_mem>>)
    %c2 = arith.constant 2 : index
    %10 = memref.load %arg1[%c2] : memref<8xi32, #tpu.memory_space<smem>>
    %c2_i32 = arith.constant 2 : i32
    %c0_i32_6 = arith.constant 0 : i32
    %11 = tpu.memref_slice %arg2[%10, %c0_i32_6] : memref<256x128xf32, #tpu.memory_space<any>> -> memref<1x128xf32, #tpu.memory_space<any>>
    %c2_i32_7 = arith.constant 2 : i32
    %c0_i32_8 = arith.constant 0 : i32
    %12 = tpu.memref_slice %arg4[%c2_i32_7, %c0_i32_8] : memref<8x128xf32, #tpu.memory_space<vmem>> -> memref<1x128xf32, #tpu.memory_space<vmem>>
    %13 = tpu.memref_slice %arg5[%c2_i32] : memref<8x!tpu.dma_semaphore, #tpu.memory_space<semaphore_mem>> -> memref<1x!tpu.dma_semaphore, #tpu.memory_space<semaphore_mem>>
    %14 = tpu.memref_squeeze %13 : memref<1x!tpu.dma_semaphore, #tpu.memory_space<semaphore_mem>> -> memref<!tpu.dma_semaphore, #tpu.memory_space<semaphore_mem>>
    tpu.enqueue_dma source(%11 : memref<1x128xf32, #tpu.memory_space<any>>) target(%12 : memref<1x128xf32, #tpu.memory_space<vmem>>) target_semaphore(%14 : memref<!tpu.dma_semaphore, #tpu.memory_space<semaphore_mem>>)
    %c3 = arith.constant 3 : index
    %15 = memref.load %arg1[%c3] : memref<8xi32, #tpu.memory_space<smem>>
    %c3_i32 = arith.constant 3 : i32
    %c0_i32_9 = arith.constant 0 : i32
    %16 = tpu.memref_slice %arg2[%15, %c0_i32_9] : memref<256x128xf32, #tpu.memory_space<any>> -> memref<1x128xf32, #tpu.memory_space<any>>
    %c3_i32_10 = arith.constant 3 : i32
    %c0_i32_11 = arith.constant 0 : i32
    %17 = tpu.memref_slice %arg4[%c3_i32_10, %c0_i32_11] : memref<8x128xf32, #tpu.memory_space<vmem>> -> memref<1x128xf32, #tpu.memory_space<vmem>>
    %18 = tpu.memref_slice %arg5[%c3_i32] : memref<8x!tpu.dma_semaphore, #tpu.memory_space<semaphore_mem>> -> memref<1x!tpu.dma_semaphore, #tpu.memory_space<semaphore_mem>>
    %19 = tpu.memref_squeeze %18 : memref<1x!tpu.dma_semaphore, #tpu.memory_space<semaphore_mem>> -> memref<!tpu.dma_semaphore, #tpu.memory_space<semaphore_mem>>
    tpu.enqueue_dma source(%16 : memref<1x128xf32, #tpu.memory_space<any>>) target(%17 : memref<1x128xf32, #tpu.memory_space<vmem>>) target_semaphore(%19 : memref<!tpu.dma_semaphore, #tpu.memory_space<semaphore_mem>>)
    %c4 = arith.constant 4 : index
    %20 = memref.load %arg1[%c4] : memref<8xi32, #tpu.memory_space<smem>>
    %c4_i32 = arith.constant 4 : i32
    %c0_i32_12 = arith.constant 0 : i32
    %21 = tpu.memref_slice %arg2[%20, %c0_i32_12] : memref<256x128xf32, #tpu.memory_space<any>> -> memref<1x128xf32, #tpu.memory_space<any>>
    %c4_i32_13 = arith.constant 4 : i32
    %c0_i32_14 = arith.constant 0 : i32
    %22 = tpu.memref_slice %arg4[%c4_i32_13, %c0_i32_14] : memref<8x128xf32, #tpu.memory_space<vmem>> -> memref<1x128xf32, #tpu.memory_space<vmem>>
    %23 = tpu.memref_slice %arg5[%c4_i32] : memref<8x!tpu.dma_semaphore, #tpu.memory_space<semaphore_mem>> -> memref<1x!tpu.dma_semaphore, #tpu.memory_space<semaphore_mem>>
    %24 = tpu.memref_squeeze %23 : memref<1x!tpu.dma_semaphore, #tpu.memory_space<semaphore_mem>> -> memref<!tpu.dma_semaphore, #tpu.memory_space<semaphore_mem>>
    tpu.enqueue_dma source(%21 : memref<1x128xf32, #tpu.memory_space<any>>) target(%22 : memref<1x128xf32, #tpu.memory_space<vmem>>) target_semaphore(%24 : memref<!tpu.dma_semaphore, #tpu.memory_space<semaphore_mem>>)
    %c5 = arith.constant 5 : index
    %25 = memref.load %arg1[%c5] : memref<8xi32, #tpu.memory_space<smem>>
    %c5_i32 = arith.constant 5 : i32
    %c0_i32_15 = arith.constant 0 : i32
    %26 = tpu.memref_slice %arg2[%25, %c0_i32_15] : memref<256x128xf32, #tpu.memory_space<any>> -> memref<1x128xf32, #tpu.memory_space<any>>
    %c5_i32_16 = arith.constant 5 : i32
    %c0_i32_17 = arith.constant 0 : i32
    %27 = tpu.memref_slice %arg4[%c5_i32_16, %c0_i32_17] : memref<8x128xf32, #tpu.memory_space<vmem>> -> memref<1x128xf32, #tpu.memory_space<vmem>>
    %28 = tpu.memref_slice %arg5[%c5_i32] : memref<8x!tpu.dma_semaphore, #tpu.memory_space<semaphore_mem>> -> memref<1x!tpu.dma_semaphore, #tpu.memory_space<semaphore_mem>>
    %29 = tpu.memref_squeeze %28 : memref<1x!tpu.dma_semaphore, #tpu.memory_space<semaphore_mem>> -> memref<!tpu.dma_semaphore, #tpu.memory_space<semaphore_mem>>
    tpu.enqueue_dma source(%26 : memref<1x128xf32, #tpu.memory_space<any>>) target(%27 : memref<1x128xf32, #tpu.memory_space<vmem>>) target_semaphore(%29 : memref<!tpu.dma_semaphore, #tpu.memory_space<semaphore_mem>>)
    %c6 = arith.constant 6 : index
    %30 = memref.load %arg1[%c6] : memref<8xi32, #tpu.memory_space<smem>>
    %c6_i32 = arith.constant 6 : i32
    %c0_i32_18 = arith.constant 0 : i32
    %31 = tpu.memref_slice %arg2[%30, %c0_i32_18] : memref<256x128xf32, #tpu.memory_space<any>> -> memref<1x128xf32, #tpu.memory_space<any>>
    %c6_i32_19 = arith.constant 6 : i32
    %c0_i32_20 = arith.constant 0 : i32
    %32 = tpu.memref_slice %arg4[%c6_i32_19, %c0_i32_20] : memref<8x128xf32, #tpu.memory_space<vmem>> -> memref<1x128xf32, #tpu.memory_space<vmem>>
    %33 = tpu.memref_slice %arg5[%c6_i32] : memref<8x!tpu.dma_semaphore, #tpu.memory_space<semaphore_mem>> -> memref<1x!tpu.dma_semaphore, #tpu.memory_space<semaphore_mem>>
    %34 = tpu.memref_squeeze %33 : memref<1x!tpu.dma_semaphore, #tpu.memory_space<semaphore_mem>> -> memref<!tpu.dma_semaphore, #tpu.memory_space<semaphore_mem>>
    tpu.enqueue_dma source(%31 : memref<1x128xf32, #tpu.memory_space<any>>) target(%32 : memref<1x128xf32, #tpu.memory_space<vmem>>) target_semaphore(%34 : memref<!tpu.dma_semaphore, #tpu.memory_space<semaphore_mem>>)
    %c7 = arith.constant 7 : index
    %35 = memref.load %arg1[%c7] : memref<8xi32, #tpu.memory_space<smem>>
    %c7_i32 = arith.constant 7 : i32
    %c0_i32_21 = arith.constant 0 : i32
    %36 = tpu.memref_slice %arg2[%35, %c0_i32_21] : memref<256x128xf32, #tpu.memory_space<any>> -> memref<1x128xf32, #tpu.memory_space<any>>
    %c7_i32_22 = arith.constant 7 : i32
    %c0_i32_23 = arith.constant 0 : i32
    %37 = tpu.memref_slice %arg4[%c7_i32_22, %c0_i32_23] : memref<8x128xf32, #tpu.memory_space<vmem>> -> memref<1x128xf32, #tpu.memory_space<vmem>>
    %38 = tpu.memref_slice %arg5[%c7_i32] : memref<8x!tpu.dma_semaphore, #tpu.memory_space<semaphore_mem>> -> memref<1x!tpu.dma_semaphore, #tpu.memory_space<semaphore_mem>>
    %39 = tpu.memref_squeeze %38 : memref<1x!tpu.dma_semaphore, #tpu.memory_space<semaphore_mem>> -> memref<!tpu.dma_semaphore, #tpu.memory_space<semaphore_mem>>
    tpu.enqueue_dma source(%36 : memref<1x128xf32, #tpu.memory_space<any>>) target(%37 : memref<1x128xf32, #tpu.memory_space<vmem>>) target_semaphore(%39 : memref<!tpu.dma_semaphore, #tpu.memory_space<semaphore_mem>>)
    %c0_i32_24 = arith.constant 0 : i32
    %c0_i32_25 = arith.constant 0 : i32
    %40 = tpu.memref_slice %arg2[%0, %c0_i32_25] : memref<256x128xf32, #tpu.memory_space<any>> -> memref<1x128xf32, #tpu.memory_space<any>>
    %c0_i32_26 = arith.constant 0 : i32
    %c0_i32_27 = arith.constant 0 : i32
    %41 = tpu.memref_slice %arg4[%c0_i32_26, %c0_i32_27] : memref<8x128xf32, #tpu.memory_space<vmem>> -> memref<1x128xf32, #tpu.memory_space<vmem>>
    %42 = tpu.memref_slice %arg5[%c0_i32_24] : memref<8x!tpu.dma_semaphore, #tpu.memory_space<semaphore_mem>> -> memref<1x!tpu.dma_semaphore, #tpu.memory_space<semaphore_mem>>
    %43 = tpu.memref_squeeze %42 : memref<1x!tpu.dma_semaphore, #tpu.memory_space<semaphore_mem>> -> memref<!tpu.dma_semaphore, #tpu.memory_space<semaphore_mem>>
    tpu.wait_dma2 semaphore(%43 : memref<!tpu.dma_semaphore, #tpu.memory_space<semaphore_mem>>) src(%40 : memref<1x128xf32, #tpu.memory_space<any>>) dst(%41 : memref<1x128xf32, #tpu.memory_space<vmem>>)
    %c1_i32_28 = arith.constant 1 : i32
    %c0_i32_29 = arith.constant 0 : i32
    %44 = tpu.memref_slice %arg2[%5, %c0_i32_29] : memref<256x128xf32, #tpu.memory_space<any>> -> memref<1x128xf32, #tpu.memory_space<any>>
    %c1_i32_30 = arith.constant 1 : i32
    %c0_i32_31 = arith.constant 0 : i32
    %45 = tpu.memref_slice %arg4[%c1_i32_30, %c0_i32_31] : memref<8x128xf32, #tpu.memory_space<vmem>> -> memref<1x128xf32, #tpu.memory_space<vmem>>
    %46 = tpu.memref_slice %arg5[%c1_i32_28] : memref<8x!tpu.dma_semaphore, #tpu.memory_space<semaphore_mem>> -> memref<1x!tpu.dma_semaphore, #tpu.memory_space<semaphore_mem>>
    %47 = tpu.memref_squeeze %46 : memref<1x!tpu.dma_semaphore, #tpu.memory_space<semaphore_mem>> -> memref<!tpu.dma_semaphore, #tpu.memory_space<semaphore_mem>>
    tpu.wait_dma2 semaphore(%47 : memref<!tpu.dma_semaphore, #tpu.memory_space<semaphore_mem>>) src(%44 : memref<1x128xf32, #tpu.memory_space<any>>) dst(%45 : memref<1x128xf32, #tpu.memory_space<vmem>>)
    %c2_i32_32 = arith.constant 2 : i32
    %c0_i32_33 = arith.constant 0 : i32
    %48 = tpu.memref_slice %arg2[%10, %c0_i32_33] : memref<256x128xf32, #tpu.memory_space<any>> -> memref<1x128xf32, #tpu.memory_space<any>>
    %c2_i32_34 = arith.constant 2 : i32
    %c0_i32_35 = arith.constant 0 : i32
    %49 = tpu.memref_slice %arg4[%c2_i32_34, %c0_i32_35] : memref<8x128xf32, #tpu.memory_space<vmem>> -> memref<1x128xf32, #tpu.memory_space<vmem>>
    %50 = tpu.memref_slice %arg5[%c2_i32_32] : memref<8x!tpu.dma_semaphore, #tpu.memory_space<semaphore_mem>> -> memref<1x!tpu.dma_semaphore, #tpu.memory_space<semaphore_mem>>
    %51 = tpu.memref_squeeze %50 : memref<1x!tpu.dma_semaphore, #tpu.memory_space<semaphore_mem>> -> memref<!tpu.dma_semaphore, #tpu.memory_space<semaphore_mem>>
    tpu.wait_dma2 semaphore(%51 : memref<!tpu.dma_semaphore, #tpu.memory_space<semaphore_mem>>) src(%48 : memref<1x128xf32, #tpu.memory_space<any>>) dst(%49 : memref<1x128xf32, #tpu.memory_space<vmem>>)
    %c3_i32_36 = arith.constant 3 : i32
    %c0_i32_37 = arith.constant 0 : i32
    %52 = tpu.memref_slice %arg2[%15, %c0_i32_37] : memref<256x128xf32, #tpu.memory_space<any>> -> memref<1x128xf32, #tpu.memory_space<any>>
    %c3_i32_38 = arith.constant 3 : i32
    %c0_i32_39 = arith.constant 0 : i32
    %53 = tpu.memref_slice %arg4[%c3_i32_38, %c0_i32_39] : memref<8x128xf32, #tpu.memory_space<vmem>> -> memref<1x128xf32, #tpu.memory_space<vmem>>
    %54 = tpu.memref_slice %arg5[%c3_i32_36] : memref<8x!tpu.dma_semaphore, #tpu.memory_space<semaphore_mem>> -> memref<1x!tpu.dma_semaphore, #tpu.memory_space<semaphore_mem>>
    %55 = tpu.memref_squeeze %54 : memref<1x!tpu.dma_semaphore, #tpu.memory_space<semaphore_mem>> -> memref<!tpu.dma_semaphore, #tpu.memory_space<semaphore_mem>>
    tpu.wait_dma2 semaphore(%55 : memref<!tpu.dma_semaphore, #tpu.memory_space<semaphore_mem>>) src(%52 : memref<1x128xf32, #tpu.memory_space<any>>) dst(%53 : memref<1x128xf32, #tpu.memory_space<vmem>>)
    %c4_i32_40 = arith.constant 4 : i32
    %c0_i32_41 = arith.constant 0 : i32
    %56 = tpu.memref_slice %arg2[%20, %c0_i32_41] : memref<256x128xf32, #tpu.memory_space<any>> -> memref<1x128xf32, #tpu.memory_space<any>>
    %c4_i32_42 = arith.constant 4 : i32
    %c0_i32_43 = arith.constant 0 : i32
    %57 = tpu.memref_slice %arg4[%c4_i32_42, %c0_i32_43] : memref<8x128xf32, #tpu.memory_space<vmem>> -> memref<1x128xf32, #tpu.memory_space<vmem>>
    %58 = tpu.memref_slice %arg5[%c4_i32_40] : memref<8x!tpu.dma_semaphore, #tpu.memory_space<semaphore_mem>> -> memref<1x!tpu.dma_semaphore, #tpu.memory_space<semaphore_mem>>
    %59 = tpu.memref_squeeze %58 : memref<1x!tpu.dma_semaphore, #tpu.memory_space<semaphore_mem>> -> memref<!tpu.dma_semaphore, #tpu.memory_space<semaphore_mem>>
    tpu.wait_dma2 semaphore(%59 : memref<!tpu.dma_semaphore, #tpu.memory_space<semaphore_mem>>) src(%56 : memref<1x128xf32, #tpu.memory_space<any>>) dst(%57 : memref<1x128xf32, #tpu.memory_space<vmem>>)
    %c5_i32_44 = arith.constant 5 : i32
    %c0_i32_45 = arith.constant 0 : i32
    %60 = tpu.memref_slice %arg2[%25, %c0_i32_45] : memref<256x128xf32, #tpu.memory_space<any>> -> memref<1x128xf32, #tpu.memory_space<any>>
    %c5_i32_46 = arith.constant 5 : i32
    %c0_i32_47 = arith.constant 0 : i32
    %61 = tpu.memref_slice %arg4[%c5_i32_46, %c0_i32_47] : memref<8x128xf32, #tpu.memory_space<vmem>> -> memref<1x128xf32, #tpu.memory_space<vmem>>
    %62 = tpu.memref_slice %arg5[%c5_i32_44] : memref<8x!tpu.dma_semaphore, #tpu.memory_space<semaphore_mem>> -> memref<1x!tpu.dma_semaphore, #tpu.memory_space<semaphore_mem>>
    %63 = tpu.memref_squeeze %62 : memref<1x!tpu.dma_semaphore, #tpu.memory_space<semaphore_mem>> -> memref<!tpu.dma_semaphore, #tpu.memory_space<semaphore_mem>>
    tpu.wait_dma2 semaphore(%63 : memref<!tpu.dma_semaphore, #tpu.memory_space<semaphore_mem>>) src(%60 : memref<1x128xf32, #tpu.memory_space<any>>) dst(%61 : memref<1x128xf32, #tpu.memory_space<vmem>>)
    %c6_i32_48 = arith.constant 6 : i32
    %c0_i32_49 = arith.constant 0 : i32
    %64 = tpu.memref_slice %arg2[%30, %c0_i32_49] : memref<256x128xf32, #tpu.memory_space<any>> -> memref<1x128xf32, #tpu.memory_space<any>>
    %c6_i32_50 = arith.constant 6 : i32
    %c0_i32_51 = arith.constant 0 : i32
    %65 = tpu.memref_slice %arg4[%c6_i32_50, %c0_i32_51] : memref<8x128xf32, #tpu.memory_space<vmem>> -> memref<1x128xf32, #tpu.memory_space<vmem>>
    %66 = tpu.memref_slice %arg5[%c6_i32_48] : memref<8x!tpu.dma_semaphore, #tpu.memory_space<semaphore_mem>> -> memref<1x!tpu.dma_semaphore, #tpu.memory_space<semaphore_mem>>
    %67 = tpu.memref_squeeze %66 : memref<1x!tpu.dma_semaphore, #tpu.memory_space<semaphore_mem>> -> memref<!tpu.dma_semaphore, #tpu.memory_space<semaphore_mem>>
    tpu.wait_dma2 semaphore(%67 : memref<!tpu.dma_semaphore, #tpu.memory_space<semaphore_mem>>) src(%64 : memref<1x128xf32, #tpu.memory_space<any>>) dst(%65 : memref<1x128xf32, #tpu.memory_space<vmem>>)
    %c7_i32_52 = arith.constant 7 : i32
    %c0_i32_53 = arith.constant 0 : i32
    %68 = tpu.memref_slice %arg2[%35, %c0_i32_53] : memref<256x128xf32, #tpu.memory_space<any>> -> memref<1x128xf32, #tpu.memory_space<any>>
    %c7_i32_54 = arith.constant 7 : i32
    %c0_i32_55 = arith.constant 0 : i32
    %69 = tpu.memref_slice %arg4[%c7_i32_54, %c0_i32_55] : memref<8x128xf32, #tpu.memory_space<vmem>> -> memref<1x128xf32, #tpu.memory_space<vmem>>
    %70 = tpu.memref_slice %arg5[%c7_i32_52] : memref<8x!tpu.dma_semaphore, #tpu.memory_space<semaphore_mem>> -> memref<1x!tpu.dma_semaphore, #tpu.memory_space<semaphore_mem>>
    %71 = tpu.memref_squeeze %70 : memref<1x!tpu.dma_semaphore, #tpu.memory_space<semaphore_mem>> -> memref<!tpu.dma_semaphore, #tpu.memory_space<semaphore_mem>>
    tpu.wait_dma2 semaphore(%71 : memref<!tpu.dma_semaphore, #tpu.memory_space<semaphore_mem>>) src(%68 : memref<1x128xf32, #tpu.memory_space<any>>) dst(%69 : memref<1x128xf32, #tpu.memory_space<vmem>>)
    %c0_56 = arith.constant 0 : index
    %c0_57 = arith.constant 0 : index
    %72 = vector.load %arg4[%c0_56, %c0_57] : memref<8x128xf32, #tpu.memory_space<vmem>>, vector<8x128xf32>
    %73 = arith.mulf %72, %72 : vector<8x128xf32>
    %cst = arith.constant dense<0.000000e+00> : vector<8xf32>
    %74 = vector.multi_reduction <add>, %73, %cst [1] : vector<8x128xf32> to vector<8xf32>
    %75 = vector.shape_cast %74 : vector<8xf32> to vector<8x1xf32>
    %76 = math.sqrt %75 : vector<8x1xf32>
    %cst_58 = arith.constant 1.000000e+00 : f32
    %77 = vector.broadcast %cst_58 : f32 to vector<8x1xf32>
    %78 = arith.cmpf ogt, %76, %77 : vector<8x1xf32>
    %cst_59 = arith.constant 1.000000e-07 : f32
    %79 = vector.broadcast %cst_59 : f32 to vector<8x1xf32>
    %80 = arith.addf %76, %79 : vector<8x1xf32>
    %cst_60 = arith.constant 1.000000e+00 : f32
    %81 = vector.broadcast %cst_60 : f32 to vector<8x1xf32>
    %82 = arith.divf %81, %80 : vector<8x1xf32>
    %cst_61 = arith.constant 1.000000e+00 : f32
    %83 = vector.broadcast %cst_61 : f32 to vector<8x1xf32>
    %84 = arith.select %78, %82, %83 : vector<8x1xi1>, vector<8x1xf32>
    %85 = vector.broadcast %84 : vector<8x1xf32> to vector<8x128xf32>
    %86 = arith.mulf %72, %85 : vector<8x128xf32>
    %87 = arith.truncf %86 : vector<8x128xf32> to vector<8x128xbf16>
    %c0_62 = arith.constant 0 : index
    %c0_63 = arith.constant 0 : index
    %88 = vector.load %arg3[%c0_62, %c0_63] : memref<8x128xbf16, #tpu.memory_space<vmem>>, vector<8x128xbf16>
    tpu.vector_store %arg3[%c0_62, %c0_63], %87 {strides = array<i32>} : memref<8x128xbf16, #tpu.memory_space<vmem>>, vector<8x128xbf16>,
    return
  }
  func.func @transform_1(%arg0: i32, %arg1: memref<8xi32, #tpu.memory_space<smem>>) -> (i32, i32) {
    %c0_i32 = arith.constant 0 : i32
    %c0_i32_0 = arith.constant 0 : i32
    %c0_i32_1 = arith.constant 0 : i32
    return %c0_i32, %c0_i32_0 : i32, i32
  }
}

</mosaic_0001>

<bundles_post_ra>
// kernel: tpu_custom_call.1
= control target key start
LH: loop header
LB: loop body
LE: loop exit
PB: predicated region body
PF: predicated region fallthrough
CT: control target
= control target key end

     0   :  { %s560_s12 = smov [#allocation5]   ;;  %s676_s0 = inlined_call_operand.hbm [shape: s32[8], index: 0, kind: input, shape index: {}]   ;;  %s677_s1 = inlined_call_operand.hbm [shape: f32[256,128], index: 1, kind: input, shape index: {}]   ;;  %s678_s2 = inlined_call_operand.hbm [shape: bf16[8,128], index: 2, kind: output, shape index: {}]  }
   0x1   :  { %s8_s11 = sshll.u32 %s676_s0, 4  ;;  %s9_s11 = int_to_ptr.hbm [resolvable:$true] %s8_s11 }
   0x2   :  { %11 = dma.hbm_to_smem %s9_s11, 16, %s560_s12, [#allocation4] }
   0x3   :  { %540 = dma.done.wait [#allocation4], 16 }
   0x4   :  { %541 = vsyncadd [#allocation4], 4294967280 }
   0x5   :  { %14 = sfence }
   0x6   :  { %15 = vsyncpa [#allocation7], 0  ;;  %s16_s13 = sld [smem:[#allocation5]]  ;;  %s561_s14 = smov [#allocation2]  }
   0x7   :  { %s27_s15 = sshll.u32 %s561_s14, 4  ;;  %s283_s16 = sld [smem:[#allocation5 + $0x1]]  ;;  %s28_s15 = int_to_ptr.vmem [resolvable:$true] %s27_s15 }
   0x8   :  { %s562_s17 = smov [#allocation2 + $0x1]   ;;  %s590_s19 = sld [smem:[#allocation5 + $0x2]] }
   0x9   :  { %s588_s18 = sshll.u32 %s562_s17, 4  ;;  %s563_s0 = smov [#allocation2 + $0x2]   ;;  %s45_s18 = int_to_ptr.vmem [resolvable:$true] %s588_s18 }
   0xa   :  { %s593_s20 = sshll.u32 %s563_s0, 4  ;;  %s595_s21 = sld [smem:[#allocation5 + $0x3]]  ;;  %s62_s20 = int_to_ptr.vmem [resolvable:$true] %s593_s20 }
   0xb   :  { %s607_s6 = scalar_lea.hbm %s677_s1, 256 }
   0xc   :  { %s17_s24 = scalar_lea.hbm %s677_s1, %s16_s13 }
   0xd   :  { %s25_s25 = sshll.u32 %s17_s24, 4  ;;  %s32_s28 = scalar_lea.hbm %s677_s1, %s283_s16  ;;  %s26_s25 = int_to_ptr.hbm [resolvable:$true] %s25_s25 }
   0xe   :  { %s42_s29 = sshll.u32 %s32_s28, 4  ;;  %s324_s30 = sshra.s32 %s26_s25, 4  ;;  %s325_s30 = int_to_ptr.hbm [resolvable:$true] %s324_s30  ;;  %s43_s29 = int_to_ptr.hbm [resolvable:$true] %s42_s29 }
   0xf   :  { %s326_s3 = scalar_lea.hbm %s325_s30, 1  ;;  %p329_p1 = scmp.lt.s32.totalorder %s325_s30, %s677_s1 }
  0x10   :  { %p327_p0 = scmp.ne.s32.totalorder %s325_s30, %s326_s3  ;;  %p330_p2 = scmp.lt.s32.totalorder %s607_s6, %s326_s3 }
  0x12   :  { %p331_p3 = por %p330_p2, %p329_p1 }
  0x14   :  { %p332_p4 = pnand %p331_p3, %p327_p0 }
  0x16   :  { %335 = shalt.err (!%p332_p4)  }
  0x17   :  { %30 = dma.hbm_to_vmem [thread:$0]  %s26_s25, 16, %s28_s15, [#allocation3] }
  0x18   :  { %s49_s11 = scalar_lea.hbm %s677_s1, %s590_s19  ;;  %s348_s12 = sshra.s32 %s43_s29, 4  ;;  %s349_s12 = int_to_ptr.hbm [resolvable:$true] %s348_s12 }
  0x19   :  { %s350_s13 = scalar_lea.hbm %s349_s12, 1  ;;  %p353_p6 = scmp.lt.s32.totalorder %s349_s12, %s677_s1 }
  0x1a   :  { %p351_p5 = scmp.ne.s32.totalorder %s349_s12, %s350_s13  ;;  %p354_p7 = scmp.lt.s32.totalorder %s607_s6, %s350_s13 }
  0x1c   :  { %p355_p8 = por %p354_p7, %p353_p6 }
  0x1e   :  { %p356_p9 = pnand %p355_p8, %p351_p5 }
  0x20   :  { %359 = shalt.err (!%p356_p9)  }
  0x21   :  { %47 = dma.hbm_to_vmem [thread:$0]  %s43_s29, 16, %s45_s18, [#allocation3 + $0x1] }
  0x22   :  { %s59_s15 = sshll.u32 %s49_s11, 4  ;;  %s66_s0 = scalar_lea.hbm %s677_s1, %s595_s21  ;;  %s60_s15 = int_to_ptr.hbm [resolvable:$true] %s59_s15 }
  0x23   :  { %s76_s22 = sshll.u32 %s66_s0, 4  ;;  %s372_s23 = sshra.s32 %s60_s15, 4  ;;  %s373_s23 = int_to_ptr.hbm [resolvable:$true] %s372_s23  ;;  %s77_s22 = int_to_ptr.hbm [resolvable:$true] %s76_s22 }
  0x24   :  { %s374_s24 = scalar_lea.hbm %s373_s23, 1  ;;  %p377_p11 = scmp.lt.s32.totalorder %s373_s23, %s677_s1 }
  0x25   :  { %p375_p10 = scmp.ne.s32.totalorder %s373_s23, %s374_s24  ;;  %p378_p12 = scmp.lt.s32.totalorder %s607_s6, %s374_s24 }
  0x27   :  { %p379_p13 = por %p378_p12, %p377_p11 }
  0x29   :  { %p380_p0 = pnand %p379_p13, %p375_p10 }
  0x2b   :  { %383 = shalt.err (!%p380_p0)  }
  0x2c   :  { %64 = dma.hbm_to_vmem [thread:$0]  %s60_s15, 16, %s62_s20, [#allocation3 + $0x2] }
  0x2d   :  { %s564_s18 = smov [#allocation2 + $0x3]   ;;  %s286_s27 = sld [smem:[#allocation5 + $0x4]] }
  0x2e   :  { %s78_s21 = sshll.u32 %s564_s18, 4  ;;  %s396_s28 = sshra.s32 %s77_s22, 4  ;;  %s79_s21 = int_to_ptr.vmem [resolvable:$true] %s78_s21  ;;  %s397_s28 = int_to_ptr.hbm [resolvable:$true] %s396_s28 }
  0x2f   :  { %s398_s29 = scalar_lea.hbm %s397_s28, 1  ;;  %p401_p2 = scmp.lt.s32.totalorder %s397_s28, %s677_s1 }
  0x30   :  { %p399_p1 = scmp.ne.s32.totalorder %s397_s28, %s398_s29  ;;  %p402_p3 = scmp.lt.s32.totalorder %s607_s6, %s398_s29 }
  0x32   :  { %p403_p4 = por %p402_p3, %p401_p2 }
  0x34   :  { %p404_p5 = pnand %p403_p4, %p399_p1 }
  0x36   :  { %407 = shalt.err (!%p404_p5)  }
  0x37   :  { %81 = dma.hbm_to_vmem [thread:$0]  %s77_s22, 16, %s79_s21, [#allocation3 + $0x3] }
  0x38   :  { %s565_s4 = smov [#allocation2 + $0x4]   ;;  %s287_s5 = sld [smem:[#allocation5 + $0x5]] }
  0x39   :  { %s95_s20 = sshll.u32 %s565_s4, 4  ;;  %s566_s7 = smov [#allocation2 + $0x5]   ;;  %s96_s20 = int_to_ptr.vmem [resolvable:$true] %s95_s20 }
  0x3a   :  { %s637_s8 = sshll.u32 %s566_s7, 4  ;;  %s288_s9 = sld [smem:[#allocation5 + $0x6]]  ;;  %s113_s8 = int_to_ptr.vmem [resolvable:$true] %s637_s8 }
  0x3b   :  { %s83_s12 = scalar_lea.hbm %s677_s1, %s286_s27  ;;  %s567_s14 = smov [#allocation2 + $0x6]  }
  0x3c   :  { %s93_s13 = sshll.u32 %s83_s12, 4  ;;  %s643_s16 = sshll.u32 %s567_s14, 4  ;;  %s94_s13 = int_to_ptr.hbm [resolvable:$true] %s93_s13  ;;  %s130_s16 = int_to_ptr.vmem [resolvable:$true] %s643_s16 }
  0x3d   :  { %s420_s15 = sshra.s32 %s94_s13, 4  ;;  %s421_s15 = int_to_ptr.hbm [resolvable:$true] %s420_s15 }
  0x3e   :  { %s422_s17 = scalar_lea.hbm %s421_s15, 1  ;;  %p425_p7 = scmp.lt.s32.totalorder %s421_s15, %s677_s1 }
  0x3f   :  { %p423_p6 = scmp.ne.s32.totalorder %s421_s15, %s422_s17  ;;  %p426_p8 = scmp.lt.s32.totalorder %s607_s6, %s422_s17 }
  0x41   :  { %p427_p9 = por %p426_p8, %p425_p7 }
  0x43   :  { %p428_p10 = pnand %p427_p9, %p423_p6 }
  0x45   :  { %431 = shalt.err (!%p428_p10)  }
  0x46   :  { %98 = dma.hbm_to_vmem [thread:$0]  %s94_s13, 16, %s96_s20, [#allocation3 + $0x4] }
  0x47   :  { %s100_s24 = scalar_lea.hbm %s677_s1, %s287_s5  ;;  %s117_s21 = scalar_lea.hbm %s677_s1, %s288_s9 }
  0x48   :  { %s110_s25 = sshll.u32 %s100_s24, 4  ;;  %s127_s27 = sshll.u32 %s117_s21, 4  ;;  %s111_s25 = int_to_ptr.hbm [resolvable:$true] %s110_s25  ;;  %s128_s27 = int_to_ptr.hbm [resolvable:$true] %s127_s27 }
  0x49   :  { %s444_s28 = sshra.s32 %s111_s25, 4  ;;  %s445_s28 = int_to_ptr.hbm [resolvable:$true] %s444_s28 }
  0x4a   :  { %s446_s29 = scalar_lea.hbm %s445_s28, 1  ;;  %p449_p12 = scmp.lt.s32.totalorder %s445_s28, %s677_s1 }
  0x4b   :  { %p447_p11 = scmp.ne.s32.totalorder %s445_s28, %s446_s29  ;;  %p450_p13 = scmp.lt.s32.totalorder %s607_s6, %s446_s29 }
  0x4d   :  { %p451_p0 = por %p450_p13, %p449_p12 }
  0x4f   :  { %p452_p1 = pnand %p451_p0, %p447_p11 }
  0x51   :  { %455 = shalt.err (!%p452_p1)  }
  0x52   :  { %115 = dma.hbm_to_vmem [thread:$0]  %s111_s25, 16, %s113_s8, [#allocation3 + $0x5] }
  0x53   :  { %s289_s4 = sld [smem:[#allocation5 + $0x7]]  ;;  %s468_s20 = sshra.s32 %s128_s27, 4  ;;  %s469_s20 = int_to_ptr.hbm [resolvable:$true] %s468_s20 }
  0x54   :  { %s470_s5 = scalar_lea.hbm %s469_s20, 1  ;;  %p473_p3 = scmp.lt.s32.totalorder %s469_s20, %s677_s1 }
  0x55   :  { %p471_p2 = scmp.ne.s32.totalorder %s469_s20, %s470_s5  ;;  %p474_p4 = scmp.lt.s32.totalorder %s607_s6, %s470_s5 }
  0x57   :  { %p475_p5 = por %p474_p4, %p473_p3 }
  0x59   :  { %p476_p6 = pnand %p475_p5, %p471_p2 }
  0x5b   :  { %479 = shalt.err (!%p476_p6)  }
  0x5c   :  { %132 = dma.hbm_to_vmem [thread:$0]  %s128_s27, 16, %s130_s16, [#allocation3 + $0x6] }
  0x5d   :  { %s568_s10 = smov [#allocation2 + $0x7]   ;;  %s134_s13 = scalar_lea.hbm %s677_s1, %s289_s4 }
  0x5e   :  { %s146_s11 = sshll.u32 %s568_s10, 4  ;;  %s144_s14 = sshll.u32 %s134_s13, 4  ;;  %s147_s11 = int_to_ptr.vmem [resolvable:$true] %s146_s11  ;;  %s145_s14 = int_to_ptr.hbm [resolvable:$true] %s144_s14 }
  0x5f   :  { %s492_s15 = sshra.s32 %s145_s14, 4  ;;  %s493_s15 = int_to_ptr.hbm [resolvable:$true] %s492_s15 }
  0x60   :  { %s494_s17 = scalar_lea.hbm %s493_s15, 1  ;;  %p497_p8 = scmp.lt.s32.totalorder %s493_s15, %s677_s1 }
  0x61   :  { %p495_p7 = scmp.ne.s32.totalorder %s493_s15, %s494_s17  ;;  %p498_p9 = scmp.lt.s32.totalorder %s607_s6, %s494_s17 }
  0x63   :  { %p499_p10 = por %p498_p9, %p497_p8 }
  0x65   :  { %p500_p11 = pnand %p499_p10, %p495_p7 }
  0x67   :  { %503 = shalt.err (!%p500_p11)  }
  0x68   :  { %149 = dma.hbm_to_vmem [thread:$0]  %s145_s14, 16, %s147_s11, [#allocation3 + $0x7] }
  0x69   :  { %542 = dma.done.wait [#allocation3], 16 }
  0x6a   :  { %543 = vsyncadd [#allocation3], 4294967280 }
  0x6b   :  { %544 = dma.done.wait [#allocation3 + $0x1], 16 }
  0x6c   :  { %545 = vsyncadd [#allocation3 + $0x1], 4294967280 }
  0x6d   :  { %546 = dma.done.wait [#allocation3 + $0x2], 16 }
  0x6e   :  { %547 = vsyncadd [#allocation3 + $0x2], 4294967280 }
  0x6f   :  { %548 = dma.done.wait [#allocation3 + $0x3], 16 }
  0x70   :  { %549 = vsyncadd [#allocation3 + $0x3], 4294967280 }
  0x71   :  { %550 = dma.done.wait [#allocation3 + $0x4], 16 }
  0x72   :  { %551 = vsyncadd [#allocation3 + $0x4], 4294967280 }
  0x73   :  { %552 = dma.done.wait [#allocation3 + $0x5], 16 }
  0x74   :  { %553 = vsyncadd [#allocation3 + $0x5], 4294967280 }
  0x75   :  { %554 = dma.done.wait [#allocation3 + $0x6], 16 }
  0x76   :  { %555 = vsyncadd [#allocation3 + $0x6], 4294967280 }
  0x77   :  { %556 = dma.done.wait [#allocation3 + $0x7], 16 }
  0x78   :  { %557 = vsyncadd [#allocation3 + $0x7], 4294967280  ;;  %v167_v0 = vld [vmem:[#allocation2] sm:$0xff]  ;;  %s569_s1 = smov [#allocation6]   ;;  %s211_s23 = sshll.u32 %s678_s2, 4  ;;  %s212_s23 = int_to_ptr.hbm [resolvable:$true] %s211_s23 }
  0x79   :  { %v168_v1 = vmul.f32 %v167_v0, %v167_v0  ;;  %s209_s6 = sshll.u32 %s569_s1, 4  ;;  %s210_s6 = int_to_ptr.vmem [resolvable:$true] %s209_s6 }
  0x7b   :  { %169 = vadd.xlane.f32.xlu0 %v168_v1 }
  0xee   :  { %v170_v2 = vpop.xlane.xlu0 %169 }
  0xef   :  { %308 = vrsqrt.f32 %v170_v2  ;;  %vm178_vm0 = vcmp.eq.f32.partialorder %v170_v2, inf  ;;  %v181_v10 = vand.u32 2147483648, %v170_v2  ;;  %vm180_vm1 = vcmp.eq.f32.partialorder %v170_v2, 0.0 }
  0xf5   :  { %v309_v3 = vpop.eup %308 }
  0xf6   :  { %v172_v4 = vmul.f32 %v309_v3, %v170_v2 }
  0xf8   :  { %v173_v5 = vmul.f32 %v309_v3, %v172_v4 }
  0xfa   :  { %v174_v6 = vmul.f32 0.5, %v173_v5 }
  0xfc   :  { %v175_v7 = vsub.f32 1.5, %v174_v6 }
  0xfe   :  { %v176_v8 = vmul.f32 %v309_v3, %v175_v7 }
 0x100   :  { %v177_v9 = vmul.f32 %v176_v8, %v170_v2 }
 0x102   :  { %v179_v11 = vsel %vm178_vm0, %v170_v2, %v177_v9 }
 0x103   :  { %v182_v12 = vsel %vm180_vm1, %v181_v10, %v179_v11 }
 0x104   :  { %v184_v13 = vadd.f32 1e-07, %v182_v12  ;;  %vm183_vm6 = vcmp.gt.f32.partialorder %v182_v12, 1.0 }
 0x106   :  { %310 = vrcp.f32 %v184_v13  ;;  %v196_v17 = vand.u32 2147483648, %v184_v13  ;;  %v194_v19 = vand.u32 2147483647, %v184_v13  ;;  %vm190_vm3 = vweird.f32 %v184_v13 }
 0x108   :  { %v197_v21 = vor.u32 1.1754944e-38, %v196_v17  ;;  %vm195_vm5 = vcmp.eq.f32.partialorder %v194_v19, 8.507059e+37 }
 0x10c   :  { %v311_v14 = vpop.eup %310 }
 0x10d   :  { %v186_v15 = vmul.f32 %v311_v14, %v184_v13  ;;  %vm191_vm2 = vweird.f32 %v311_v14 }
 0x10e   :  { %vm192_vm4 = vmor %vm190_vm3, %vm191_vm2 }
 0x10f   :  { %v187_v16 = vsub.f32 1.0, %v186_v15 }
 0x111   :  { %v188_v18 = vmul.f32 %v311_v14, %v187_v16 }
 0x113   :  { %v189_v20 = vadd.f32 %v311_v14, %v188_v18 }
 0x115   :  { %v193_v22 = vsel %vm192_vm4, %v311_v14, %v189_v20 }
 0x116   :  { %v198_v23 = vsel %vm195_vm5, %v197_v21, %v193_v22 }
 0x117   :  { %v200_v24 = vsel %vm183_vm6, %v198_v23, 1.0 }
 0x118   :  { %v201_v25 = vmul.f32 %v200_v24, %v167_v0 }
 0x11a   :  { %v202_v26 = vpack.c.bf16 %v201_v25, %v201_v25 }
 0x11c   :  { %203 = vst [vmem:[#allocation6] sm:$0xf] %v202_v26 }
 0x11d   :  { %214 = dma.vmem_to_hbm [thread:$0]  %s210_s6, 64, %s212_s23, [#allocation7]  }
 0x11e   :  { %558 = dma.done.wait [#allocation7], 64  }
 0x11f   :  { %559 = vsyncadd [#allocation7], 4294967232 }
 0x120   :  { %219 = vsyncpa [#allocation7], 1 }
 0x121   :  { %220 = vsyncmov [#allocation3] }
 0x124   :  { %s221_s24 = vpop.sfrf %220 }
 0x125   :  { %p290_p12 = scmp.ne.s32.totalorder %s221_s24, 0 }
 0x127   :  { %225 = shalt.err (%p290_p12)  }
 0x128   :  { %227 = vsyncmov [#allocation3 + $0x1] }
 0x12b   :  { %s228_s25 = vpop.sfrf %227 }
 0x12c   :  { %p291_p13 = scmp.ne.s32.totalorder %s228_s25, 0 }
 0x12e   :  { %232 = shalt.err (%p291_p13)  }
 0x12f   :  { %234 = vsyncmov [#allocation3 + $0x2] }
 0x132   :  { %s235_s26 = vpop.sfrf %234 }
 0x133   :  { %p292_p0 = scmp.ne.s32.totalorder %s235_s26, 0 }
 0x135   :  { %239 = shalt.err (%p292_p0)  }
 0x136   :  { %241 = vsyncmov [#allocation3 + $0x3] }
 0x139   :  { %s242_s2 = vpop.sfrf %241 }
 0x13a   :  { %p293_p1 = scmp.ne.s32.totalorder %s242_s2, 0 }
 0x13c   :  { %246 = shalt.err (%p293_p1)  }
 0x13d   :  { %248 = vsyncmov [#allocation3 + $0x4] }
 0x140   :  { %s249_s18 = vpop.sfrf %248 }
 0x141   :  { %p294_p2 = scmp.ne.s32.totalorder %s249_s18, 0 }
 0x143   :  { %253 = shalt.err (%p294_p2)  }
 0x144   :  { %255 = vsyncmov [#allocation3 + $0x5] }
 0x147   :  { %s256_s21 = vpop.sfrf %255 }
 0x148   :  { %p295_p3 = scmp.ne.s32.totalorder %s256_s21, 0 }
 0x14a   :  { %260 = shalt.err (%p295_p3)  }
 0x14b   :  { %262 = vsyncmov [#allocation3 + $0x6] }
 0x14e   :  { %s263_s27 = vpop.sfrf %262 }
 0x14f   :  { %p296_p4 = scmp.ne.s32.totalorder %s263_s27, 0 }
 0x151   :  { %267 = shalt.err (%p296_p4)  }
 0x152   :  { %269 = vsyncmov [#allocation3 + $0x7] }
 0x155   :  { %s270_s28 = vpop.sfrf %269 }
 0x156   :  { %p297_p5 = scmp.ne.s32.totalorder %s270_s28, 0 }
 0x158   :  { %274 = shalt.err (%p297_p5)  }

</bundles_post_ra>
